<compile_context>
chip_gen: v5e
topology: v5e:2x2
jax: 0.10.0
libtpu: 0.0.40
codegen_flags: <defaults>
</compile_context>

<pallas_src>
import functools

import jax
import jax.numpy as jnp
from jax.experimental import pallas as pl
from jax.experimental.pallas import tpu as pltpu


# ----------------------------------------------------------------------------- kernels
def _linear_fwd_kernel(x_ref, w_ref, b_ref, o_ref):
    # x_ref: (TN, PD) f32 lane-dense rows (PD = pack*D, typically 128)
    # w_ref: (PD, OW) f32 block-diagonal weight (OW = 2*pack), resident
    # b_ref: (1, OW)  f32 packed bias, resident
    # o_ref: (TN, OW) f32 packed logits
    o_ref[...] = (
        jnp.dot(x_ref[...], w_ref[...], preferred_element_type=jnp.float32)
        + b_ref[...]
    )


def _linear_pred_kernel(x_ref, wd_ref, bd_ref, o_ref):
    # Fused forward + 2-way argmax via the logit difference (logit1 - logit0).
    # wd_ref: (PD, pack) block-diagonal (w1 - w0); bd_ref: (1, pack) bias diff.
    diff = (
        jnp.dot(x_ref[...], wd_ref[...], preferred_element_type=jnp.float32)
        + bd_ref[...]
    )
    # Strict '>' so ties pick class 0 (torch.argmax first-occurrence semantics).
    o_ref[...] = (diff > 0.0).astype(jnp.int32)


# ----------------------------------------------------------------------------- helpers
_SMALL_N_FALLBACK = 512  # below this, a plain XLA dot beats the kernel launch cost


def _packing(n, d):
    """Pack `pack` consecutive rows into one lane-dense 128-wide row if possible."""
    if d < 128 and 128 % d == 0:
        pack = 128 // d
        if n % pack == 0:
            return pack
    return 1


def _choose_packed_tile(n_packed, tile_rows, pack):
    """Pick an 8-aligned packed-row tile; prefer >=2 grid steps (v7x megacore)."""
    max_tp = max(8, (tile_rows // pack) // 8 * 8)
    if n_packed <= 16:
        return n_packed                       # single full-extent block
    half = -(-n_packed // 2)                  # ceil(n_packed / 2)
    half8 = ((half + 7) // 8) * 8             # sublane-align
    tn = min(max_tp, half8)
    if tn >= n_packed:
        return n_packed
    return tn


def _vmem_limit_bytes(tn_p, pd, ow, elem_bytes=4):
    """Explicit scoped-VMEM budget for the chosen tile (double-buffered I/O)."""
    lane_pad = lambda v: -(-v // 128) * 128
    sub_pad = lambda v: -(-v // 8) * 8
    x_buf = tn_p * lane_pad(pd) * elem_bytes
    o_buf = tn_p * lane_pad(ow) * 4
    w_buf = sub_pad(pd) * lane_pad(ow) * 4
    total = 2 * (x_buf + o_buf) + 2 * w_buf + (2 << 20)   # + headroom
    # Clamp: >=16 MiB (v5e default) and <=32 MiB (safe on v7x's 64 MiB part).
    return int(min(max(total, 16 << 20), 32 << 20))


def _packed_call(kernel, x_p, w_blk, b_blk, out_dtype, tn_p, cost=None):
    n_p, pd = x_p.shape
    ow = w_blk.shape[1]
    grid = (pl.cdiv(n_p, tn_p),)
    return pl.pallas_call(
        kernel,
        out_shape=jax.ShapeDtypeStruct((n_p, ow), out_dtype),
        grid_spec=pltpu.PrefetchScalarGridSpec(
            num_scalar_prefetch=0,
            grid=grid,
            in_specs=[
                pl.BlockSpec((tn_p, pd), lambda i: (i, 0)),   # x tile (pipelined DMA)
                pl.BlockSpec((pd, ow), lambda i: (0, 0)),     # weight, resident
                pl.BlockSpec((1, ow), lambda i: (0, 0)),      # bias, resident
            ],
            out_specs=pl.BlockSpec((tn_p, ow), lambda i: (i, 0)),
        ),
        compiler_params=pltpu.CompilerParams(
            dimension_semantics=("parallel",),
            vmem_limit_bytes=_vmem_limit_bytes(tn_p, pd, ow),
        ),
        cost_estimate=cost,
    )(x_p, w_blk, b_blk)


# ----------------------------------------------------------------------------- wrappers
def linear_net_forward(x, weight, bias, *, tile_rows=8192,
                       min_pallas_n=_SMALL_N_FALLBACK):
    """LinearNet.forward: x @ weight.T + bias, returned as (N, 2) float32.

    x:      (N, D) float32
    weight: (2, D) float32 (PyTorch nn.Linear convention)
    bias:   (2,)   float32
    """
    x = x.astype(jnp.float32)
    weight = weight.astype(jnp.float32)
    bias = bias.astype(jnp.float32)
    n, d = x.shape

    if n < min_pallas_n:
        # Tiny batches: pallas_call launch + DMA setup dominates — use plain XLA.
        return x @ weight.T + bias[None, :]

    pack = _packing(n, d)
    w_t = weight.T                                             # (D, 2)
    if pack > 1:
        # Block-diagonal weight / tiled bias; tiny (128 x 8) one-time host prep.
        w_blk = jnp.kron(jnp.eye(pack, dtype=jnp.float32), w_t)      # (pack*D, 2*pack)
        b_blk = jnp.tile(bias, pack).reshape(1, 2 * pack)
        x_p = x.reshape(n // pack, pack * d)                          # free reshape
    else:
        w_blk = w_t
        b_blk = bias.reshape(1, 2)
        x_p = x

    n_p, pd = x_p.shape
    tn_p = _choose_packed_tile(n_p, tile_rows, pack)
    cost = pl.CostEstimate(
        flops=2 * n * d * 2,
        transcendentals=0,
        bytes_accessed=(n * d + pd * w_blk.shape[1] + w_blk.shape[1] + n * 2) * 4,
    )
    out_p = _packed_call(_linear_fwd_kernel, x_p, w_blk, b_blk,
                         jnp.float32, tn_p, cost)
    return out_p.reshape(n, 2)                                 # free row-major reshape


def linear_net_predict(x, weight, bias, *, tile_rows=8192,
                       min_pallas_n=_SMALL_N_FALLBACK):
    """LinearNet.predict: per-row argmax over the 2 logits. Returns (N,) int32."""
    x = x.astype(jnp.float32)
    weight = weight.astype(jnp.float32)
    bias = bias.astype(jnp.float32)
    n, d = x.shape

    if n < min_pallas_n:
        return jnp.argmax(x @ weight.T + bias[None, :], axis=-1).astype(jnp.int32)

    pack = _packing(n, d)
    w_diff = (weight[1] - weight[0]).reshape(d, 1)             # (D, 1)
    b_diff = (bias[1] - bias[0]).reshape(1, 1)
    if pack > 1:
        wd_blk = jnp.kron(jnp.eye(pack, dtype=jnp.float32), w_diff)   # (pack*D, pack)
        bd_blk = jnp.tile(b_diff, (1, pack))                          # (1, pack)
        x_p = x.reshape(n // pack, pack * d)
    else:
        wd_blk = w_diff
        bd_blk = b_diff
        x_p = x

    n_p, _ = x_p.shape
    tn_p = _choose_packed_tile(n_p, tile_rows, pack)
    preds_p = _packed_call(_linear_pred_kernel, x_p, wd_blk, bd_blk,
                           jnp.int32, tn_p)
    return preds_p.reshape(n)


# ----------------------------------------------------------------------------- demo
if __name__ == "__main__":
    key = jax.random.PRNGKey(0)
    k_x, k_w, k_b = jax.random.split(key, 3)

    batch = 8
    dimensions = 32  # data dimensionality -> fc1 = Linear(dimensions, 2)

    x = jax.random.normal(k_x, (batch, dimensions), dtype=jnp.float32)
    # Deterministic param init (mimic PyTorch's uniform(-1/sqrt(D), 1/sqrt(D))).
    bound = 1.0 / jnp.sqrt(jnp.float32(dimensions))
    weight = jax.random.uniform(k_w, (2, dimensions), jnp.float32, -bound, bound)
    bias = jax.random.uniform(k_b, (2,), jnp.float32, -bound, bound)

    ref = x @ weight.T + bias

    # Small batch — force the Pallas path (min_pallas_n=0) to exercise the kernel.
    out = jax.block_until_ready(linear_net_forward(x, weight, bias, min_pallas_n=0))
    assert out.shape == (batch, 2)
    assert jnp.allclose(out, ref, atol=1e-5, rtol=1e-5)

    preds = jax.block_until_ready(
        linear_net_predict(x, weight, bias, min_pallas_n=0))
    assert preds.shape == (batch,)
    assert jnp.array_equal(preds, jnp.argmax(ref, axis=-1).astype(jnp.int32))

    # Streaming regime: multi-tile path (packed DMA, ragged tail, >=2 grid steps).
    big_n = 8192 + 4
    xb = jax.random.normal(jax.random.PRNGKey(1), (big_n, dimensions), jnp.float32)
    refb = xb @ weight.T + bias

    outb = jax.block_until_ready(
        linear_net_forward(xb, weight, bias, tile_rows=4096))
    assert outb.shape == (big_n, 2)
    assert jnp.allclose(outb, refb, atol=2e-4, rtol=2e-4)

    predsb = jax.block_until_ready(
        linear_net_predict(xb, weight, bias, tile_rows=4096))
    ref_predsb = jnp.argmax(refb, axis=-1).astype(jnp.int32)
    # Allow disagreement only where the two logits are numerically tied.
    margin = jnp.abs(refb[:, 1] - refb[:, 0])
    assert not bool(jnp.any((predsb != ref_predsb) & (margin > 1e-4)))

    print("KERNEL_OK")
</pallas_src>

<mosaic_0001>
module attributes {stable_mosaic.version = 11 : i64} {
  func.func @_linear_fwd_kernel(%arg0: i32, %arg1: memref<2x128xf32, #tpu.memory_space<vmem>>, %arg2: memref<128x8xf32, #tpu.memory_space<vmem>>, %arg3: memref<1x8xf32, #tpu.memory_space<vmem>>, %arg4: memref<2x8xf32, #tpu.memory_space<vmem>>) attributes {dimension_semantics = [#tpu.dimension_semantics<parallel>], iteration_bounds = array<i64: 1>, scalar_prefetch = 0 : i64, scratch_operands = 0 : i64, tpu.core_type = #tpu.core_type<tc>, window_params = [{transform_indices = @transform_0, window_bounds = array<i64: 2, 128>}, {pipeline_mode = #tpu.pipeline_mode<synchronous>, transform_indices = @transform_1, window_bounds = array<i64: 128, 8>}, {pipeline_mode = #tpu.pipeline_mode<synchronous>, transform_indices = @transform_2, window_bounds = array<i64: 1, 8>}, {transform_indices = @transform_3, window_bounds = array<i64: 2, 8>}]} {
    %c0 = arith.constant 0 : index
    %c0_0 = arith.constant 0 : index
    %0 = vector.load %arg1[%c0, %c0_0] : memref<2x128xf32, #tpu.memory_space<vmem>>, vector<2x128xf32>
    %c0_1 = arith.constant 0 : index
    %c0_2 = arith.constant 0 : index
    %1 = vector.load %arg2[%c0_1, %c0_2] : memref<128x8xf32, #tpu.memory_space<vmem>>, vector<128x8xf32>
    %cst = arith.constant dense<0.000000e+00> : vector<2x8xf32>
    %2 = tpu.matmul %0, %1, %cst {dimension_numbers = #tpu.dot_dimension_numbers<[1], [0], [0], [1], [0, 0, 1, 1], [], []>} : vector<2x128xf32>, vector<128x8xf32>, vector<2x8xf32> -> vector<2x8xf32>
    %c0_3 = arith.constant 0 : index
    %c0_4 = arith.constant 0 : index
    %3 = vector.load %arg3[%c0_3, %c0_4] : memref<1x8xf32, #tpu.memory_space<vmem>>, vector<1x8xf32>
    %4 = vector.broadcast %3 : vector<1x8xf32> to vector<2x8xf32>
    %5 = arith.addf %2, %4 : vector<2x8xf32>
    %c0_5 = arith.constant 0 : index
    %c0_6 = arith.constant 0 : index
    %6 = vector.load %arg4[%c0_5, %c0_6] : memref<2x8xf32, #tpu.memory_space<vmem>>, vector<2x8xf32>
    tpu.vector_store %arg4[%c0_5, %c0_6], %5 {strides = array<i32>} : memref<2x8xf32, #tpu.memory_space<vmem>>, vector<2x8xf32>,
    return
  }
  func.func @transform_0(%arg0: i32) -> (i32, i32) {
    %c0_i32 = arith.constant 0 : i32
    %c0_i32_0 = arith.constant 0 : i32
    return %arg0, %c0_i32 : i32, i32
  }
  func.func @transform_1(%arg0: i32) -> (i32, i32) {
    %c0_i32 = arith.constant 0 : i32
    %c0_i32_0 = arith.constant 0 : i32
    %c0_i32_1 = arith.constant 0 : i32
    return %c0_i32, %c0_i32_0 : i32, i32
  }
  func.func @transform_2(%arg0: i32) -> (i32, i32) {
    %c0_i32 = arith.constant 0 : i32
    %c0_i32_0 = arith.constant 0 : i32
    %c0_i32_1 = arith.constant 0 : i32
    return %c0_i32, %c0_i32_0 : i32, i32
  }
  func.func @transform_3(%arg0: i32) -> (i32, i32) {
    %c0_i32 = arith.constant 0 : i32
    %c0_i32_0 = arith.constant 0 : i32
    return %arg0, %c0_i32 : i32, i32
  }
}

</mosaic_0001>

<bundles_post_ra>
// kernel: tpu_custom_call.1
= control target key start
LH: loop header
LB: loop body
LE: loop exit
PB: predicated region body
PF: predicated region fallthrough
CT: control target
= control target key end

     0   :  { %s180_s0 = inlined_call_operand.vmem [shape: f32[2,128], index: 0, kind: input, shape index: {}]   ;;  %s181_s1 = inlined_call_operand.vmem [shape: f32[128,8], index: 1, kind: input, shape index: {}]   ;;  %s182_s2 = inlined_call_operand.vmem [shape: f32[1,8], index: 2, kind: input, shape index: {}]   ;;  %s183_s3 = inlined_call_operand.hbm [shape: f32[2,8], index: 3, kind: output, shape index: {}]  }
   0x1   :  { %v31_v0 = vld [vmem:[%s181_s1 + $0x78] sm:$0xff]  ;;  %v30_v1 = vld [vmem:[%s181_s1 + $0x70] sm:$0xff]  ;;  %v29_v2 = vld [vmem:[%s181_s1 + $0x68] sm:$0xff] }
   0x2   :  { %36 = vmatpush.msra.mxu0 %v31_v0  ;;  %v28_v3 = vld [vmem:[%s181_s1 + $0x60] sm:$0xff]  ;;  %v27_v4 = vld [vmem:[%s181_s1 + $0x58] sm:$0xff] }
   0x4   :  { %37 = vmatpush.msra.mxu0 %v30_v1 }
   0x6   :  { %38 = vmatpush.msra.mxu0 %v29_v2 }
   0x7   :  { %8 = vsyncpa [#allocation3], 0  ;;  %v26_v5 = vld [vmem:[%s181_s1 + $0x50] sm:$0xff]  ;;  %v25_v6 = vld [vmem:[%s181_s1 + $0x48] sm:$0xff]  ;;  %s102_s21 = smov [#allocation2]   ;;  %s65_s25 = sshll.u32 %s183_s3, 4  ;;  %s66_s25 = int_to_ptr.hbm [resolvable:$true] %s65_s25 }
   0x8   :  { %39 = vmatpush.msra.mxu0 %v28_v3  ;;  %v24_v7 = vld [vmem:[%s181_s1 + $0x40] sm:$0xff]  ;;  %v23_v8 = vld [vmem:[%s181_s1 + $0x38] sm:$0xff]  ;;  %v22_v9 = vld [vmem:[%s181_s1 + $0x30] sm:$0xff]  ;;  %s63_s22 = sshll.u32 %s102_s21, 4  ;;  %vm56_vm0 = vcmask 58368   ;;  %s64_s22 = int_to_ptr.vmem [resolvable:$true] %s63_s22 }
   0x9   :  { %v21_v10 = vld [vmem:[%s181_s1 + $0x28] sm:$0xff]  ;;  %v20_v11 = vld [vmem:[%s181_s1 + $0x20] sm:$0xff]  ;;  %v19_v12 = vld [vmem:[%s181_s1 + $0x18] sm:$0xff] }
   0xa   :  { %40 = vmatpush.msra.mxu0 %v27_v4  ;;  %v18_v13 = vld [vmem:[%s181_s1 + $0x10] sm:$0xff]  ;;  %v17_v14 = vld [vmem:[%s181_s1 + $0x8] sm:$0xff]  ;;  %v16_v15 = vld [vmem:[%s181_s1] sm:$0xff] }
   0xb   :  { %v15_v16 = vld [vmem:[%s180_s0] sm:$0x3] }
   0xc   :  { %41 = vmatpush.msra.mxu0 %v26_v5  ;;  %v75_v17 = vld [vmem:[%s182_s2] ss:$0 sm:$0xff] }
   0xe   :  { %42 = vmatpush.msra.mxu0 %v25_v6 }
  0x10   :  { %43 = vmatpush.msra.mxu0 %v24_v7 }
  0x12   :  { %44 = vmatpush.msra.mxu0 %v23_v8 }
  0x14   :  { %45 = vmatpush.msra.mxu0 %v22_v9 }
  0x16   :  { %46 = vmatpush.msra.mxu0 %v21_v10 }
  0x18   :  { %47 = vmatpush.msra.mxu0 %v20_v11 }
  0x1a   :  { %48 = vmatpush.msra.mxu0 %v19_v12 }
  0x1c   :  { %49 = vmatpush.msra.mxu0 %v18_v13 }
  0x1e   :  { %50 = vmatpush.msra.mxu0 %v17_v14 }
  0x20   :  { %51 = vmatpush.msra.mxu0 %v16_v15 }
  0x21   :  { %52 = vmatmul.f32.vlgmr.msra.gmra.mxu0 %v15_v16 }
  0x9e   :  { %v53_v18 = vpop.f32.mrf.mxu0 }
  0x9f   :  { %v54_v19 = vadd.f32 %v75_v17, %v53_v18 }
  0xa1   :  { %57 = vst.msk [vmem:[#allocation2] sm:$0x3] %vm56_vm0, %v54_v19 }
  0xa2   :  { %68 = dma.vmem_to_hbm [thread:$0]  %s64_s22, 32, %s66_s25, [#allocation3]  }
  0xa3   :  { %100 = dma.done.wait [#allocation3], 32  }
  0xa4   :  { %101 = vsyncadd [#allocation3], 4294967264 }
  0xa5   :  { %73 = vsyncpa [#allocation3], 1 }

</bundles_post_ra>
